<compile_context>
chip_gen: v6e
topology: v6e:2x2x1
jax: 0.10.0
libtpu: 0.0.40
codegen_flags: <defaults>
</compile_context>

<pallas_src>
import functools

import jax
import jax.numpy as jnp
from jax.experimental import pallas as pl
from jax.experimental.pallas import tpu as pltpu

LOG_STD_MAX = 2.0
LOG_STD_MIN = -5.0


def _round_up(x, m):
    return ((x + m - 1) // m) * m


def actor_kernel(x_ref, w1_ref, b1_ref, w2_ref, b2_ref, wh_ref, bh_ref,
                 out_ref, *, act_dim):
    # fc1 + relu  (bf16 MXU operands, f32 accumulation and f32 epilogue)
    x = x_ref[...].astype(jnp.bfloat16)
    h1 = jnp.dot(x, w1_ref[...], preferred_element_type=jnp.float32) + b1_ref[...]
    h1 = jnp.maximum(h1, 0.0)

    # fc2 + relu
    h2 = jnp.dot(h1.astype(jnp.bfloat16), w2_ref[...],
                 preferred_element_type=jnp.float32) + b2_ref[...]
    h2 = jnp.maximum(h2, 0.0)

    # Fused heads: lanes [0, act_dim) = mean, [act_dim, 2*act_dim) = logstd
    # pre-activation, remaining lanes are zero padding.
    z = jnp.dot(h2.astype(jnp.bfloat16), wh_ref[...],
                preferred_element_type=jnp.float32) + bh_ref[...]

    # tanh squash + rescale applied only on the logstd lanes (lane mask).
    ls = LOG_STD_MIN + 0.5 * (LOG_STD_MAX - LOG_STD_MIN) * (jnp.tanh(z) + 1.0)
    lane = jax.lax.broadcasted_iota(jnp.int32, z.shape, 1)
    is_logstd = (lane >= act_dim) & (lane < 2 * act_dim)
    out_ref[...] = jnp.where(is_logstd, ls, z)


def pack_actor_params(params):
    """Pack pre-transposed f32 params into the padded / fused / bf16 layout the
    kernel consumes. Weights -> bf16 (MXU operands), biases stay f32."""
    w1, b1 = params["w1"], params["b1"]
    w2, b2 = params["w2"], params["b2"]
    wm, bm = params["wm"], params["bm"]
    ws, bs = params["ws"], params["bs"]

    obs_dim, hid = w1.shape
    act_dim = wm.shape[1]

    obs_pad = _round_up(obs_dim, 128)
    head_pad = _round_up(2 * act_dim, 128)

    w1p = jnp.zeros((obs_pad, hid), jnp.float32).at[:obs_dim, :].set(w1)
    whp = jnp.zeros((hid, head_pad), jnp.float32)
    whp = whp.at[:, :act_dim].set(wm).at[:, act_dim:2 * act_dim].set(ws)
    bhp = jnp.zeros((1, head_pad), jnp.float32)
    bhp = bhp.at[:, :act_dim].set(bm).at[:, act_dim:2 * act_dim].set(bs)

    return dict(
        w1=w1p.astype(jnp.bfloat16), b1=b1.astype(jnp.float32),
        w2=w2.astype(jnp.bfloat16), b2=b2.astype(jnp.float32),
        wh=whp.astype(jnp.bfloat16), bh=bhp.astype(jnp.float32),
        act_dim=int(act_dim), obs_dim=int(obs_dim),
    )


def actor_forward(x, packed):
    """x: (B, obs_dim) float32. packed: output of pack_actor_params."""
    B, obs_dim = x.shape
    obs_pad, hid = packed["w1"].shape
    head_pad = packed["wh"].shape[1]
    act_dim = packed["act_dim"]

    # Batch tile: multiple of 8 sublanes; cap at 256 (good HBM-roofline tile,
    # comfortably within v7x's 64 MiB VMEM with double buffering).
    tb = 256 if B >= 256 else _round_up(B, 8)
    b_pad = _round_up(B, tb)

    if (b_pad, obs_pad) != (B, obs_dim):
        xp = jnp.zeros((b_pad, obs_pad), jnp.float32).at[:B, :obs_dim].set(x)
    else:
        xp = x.astype(jnp.float32)

    # TODO(synk): for per-env-step inference (B~1..8) the wall time is weight
    # DMA + launch overhead; keep weights resident across calls (cross-
    # pallas_call prefetch, P10) or batch many actor evals per call.

    out = pl.pallas_call(
        functools.partial(actor_kernel, act_dim=act_dim),
        out_shape=jax.ShapeDtypeStruct((b_pad, head_pad), jnp.float32),
        grid=(b_pad // tb,),
        in_specs=[
            pl.BlockSpec((tb, obs_pad), lambda i: (i, 0)),
            # Weights / biases: constant index_map -> DMA'd once, stay resident
            # in VMEM across all batch-grid steps.
            pl.BlockSpec((obs_pad, hid), lambda i: (0, 0)),
            pl.BlockSpec((1, hid), lambda i: (0, 0)),
            pl.BlockSpec((hid, hid), lambda i: (0, 0)),
            pl.BlockSpec((1, hid), lambda i: (0, 0)),
            pl.BlockSpec((hid, head_pad), lambda i: (0, 0)),
            pl.BlockSpec((1, head_pad), lambda i: (0, 0)),
        ],
        out_specs=pl.BlockSpec((tb, head_pad), lambda i: (i, 0)),
        compiler_params=pltpu.CompilerParams(
            dimension_semantics=("parallel",)),
    )(xp, packed["w1"], packed["b1"], packed["w2"], packed["b2"],
      packed["wh"], packed["bh"])

    mean = out[:B, :act_dim]
    log_std = out[:B, act_dim:2 * act_dim]
    return mean, log_std


def init_linear(key, in_features, out_features):
    """PyTorch-style nn.Linear init (uniform +-1/sqrt(fan_in)),
    returned pre-transposed: weight (in, out), bias (1, out)."""
    kw, kb = jax.random.split(key)
    bound = 1.0 / jnp.sqrt(jnp.float32(in_features))
    w = jax.random.uniform(kw, (in_features, out_features), jnp.float32, -bound, bound)
    b = jax.random.uniform(kb, (1, out_features), jnp.float32, -bound, bound)
    return w, b


def reference_forward(x, params):
    h1 = jax.nn.relu(x @ params["w1"] + params["b1"])
    h2 = jax.nn.relu(h1 @ params["w2"] + params["b2"])
    mean = h2 @ params["wm"] + params["bm"]
    ls = jnp.tanh(h2 @ params["ws"] + params["bs"])
    ls = LOG_STD_MIN + 0.5 * (LOG_STD_MAX - LOG_STD_MIN) * (ls + 1.0)
    return mean, ls


if __name__ == "__main__":
    # Small shapes consistent with a continuous-control env:
    # obs_dim=17, act_dim=6 (HalfCheetah-like), batch=8, hidden=256 (from module).
    B, OBS, HID, ACT = 8, 17, 256, 6

    key = jax.random.PRNGKey(0)
    kx, k1, k2, k3, k4 = jax.random.split(key, 5)

    x = jax.random.normal(kx, (B, OBS), jnp.float32)

    w1, b1 = init_linear(k1, OBS, HID)
    w2, b2 = init_linear(k2, HID, HID)
    wm, bm = init_linear(k3, HID, ACT)
    ws, bs = init_linear(k4, HID, ACT)

    params = dict(w1=w1, b1=b1, w2=w2, b2=b2, wm=wm, bm=bm, ws=ws, bs=bs)
    packed = pack_actor_params(params)

    mean, log_std = actor_forward(x, packed)
    mean, log_std = jax.block_until_ready((mean, log_std))

    # Verify against plain-JAX f32 reference (loosened tolerance: matmul
    # operands are rounded to bf16 in the kernel, accumulation stays f32).
    ref_mean, ref_ls = reference_forward(x, params)
    assert mean.shape == (B, ACT) and log_std.shape == (B, ACT)
    assert jnp.allclose(mean, ref_mean, atol=5e-2, rtol=5e-2)
    assert jnp.allclose(log_std, ref_ls, atol=5e-2, rtol=5e-2)
    assert bool(jnp.all(log_std >= LOG_STD_MIN)) and bool(jnp.all(log_std <= LOG_STD_MAX))

    print("KERNEL_OK")
</pallas_src>

<mosaic_0001>
module attributes {stable_mosaic.version = 11 : i64} {
  func.func @actor_kernel(%arg0: i32, %arg1: memref<8x128xf32, #tpu.memory_space<vmem>>, %arg2: memref<128x256xbf16, #tpu.memory_space<vmem>>, %arg3: memref<1x256xf32, #tpu.memory_space<vmem>>, %arg4: memref<256x256xbf16, #tpu.memory_space<vmem>>, %arg5: memref<1x256xf32, #tpu.memory_space<vmem>>, %arg6: memref<256x128xbf16, #tpu.memory_space<vmem>>, %arg7: memref<1x128xf32, #tpu.memory_space<vmem>>, %arg8: memref<8x128xf32, #tpu.memory_space<vmem>>) attributes {dimension_semantics = [#tpu.dimension_semantics<parallel>], iteration_bounds = array<i64: 1>, scalar_prefetch = 0 : i64, scratch_operands = 0 : i64, tpu.core_type = #tpu.core_type<tc>, window_params = [{transform_indices = @transform_0, window_bounds = array<i64: 8, 128>}, {pipeline_mode = #tpu.pipeline_mode<synchronous>, transform_indices = @transform_1, window_bounds = array<i64: 128, 256>}, {pipeline_mode = #tpu.pipeline_mode<synchronous>, transform_indices = @transform_2, window_bounds = array<i64: 1, 256>}, {pipeline_mode = #tpu.pipeline_mode<synchronous>, transform_indices = @transform_3, window_bounds = array<i64: 256, 256>}, {pipeline_mode = #tpu.pipeline_mode<synchronous>, transform_indices = @transform_4, window_bounds = array<i64: 1, 256>}, {pipeline_mode = #tpu.pipeline_mode<synchronous>, transform_indices = @transform_5, window_bounds = array<i64: 256, 128>}, {pipeline_mode = #tpu.pipeline_mode<synchronous>, transform_indices = @transform_6, window_bounds = array<i64: 1, 128>}, {transform_indices = @transform_7, window_bounds = array<i64: 8, 128>}]} {
    %c0 = arith.constant 0 : index
    %c0_0 = arith.constant 0 : index
    %0 = vector.load %arg1[%c0, %c0_0] : memref<8x128xf32, #tpu.memory_space<vmem>>, vector<8x128xf32>
    %1 = arith.truncf %0 : vector<8x128xf32> to vector<8x128xbf16>
    %c0_1 = arith.constant 0 : index
    %c0_2 = arith.constant 0 : index
    %2 = vector.load %arg2[%c0_1, %c0_2] : memref<128x256xbf16, #tpu.memory_space<vmem>>, vector<128x256xbf16>
    %cst = arith.constant dense<0.000000e+00> : vector<8x256xf32>
    %3 = tpu.matmul %1, %2, %cst {dimension_numbers = #tpu.dot_dimension_numbers<[1], [0], [0], [1], [0, 0, 1, 1], [], []>} : vector<8x128xbf16>, vector<128x256xbf16>, vector<8x256xf32> -> vector<8x256xf32>
    %c0_3 = arith.constant 0 : index
    %c0_4 = arith.constant 0 : index
    %4 = vector.load %arg3[%c0_3, %c0_4] : memref<1x256xf32, #tpu.memory_space<vmem>>, vector<1x256xf32>
    %5 = vector.broadcast %4 : vector<1x256xf32> to vector<8x256xf32>
    %6 = arith.addf %3, %5 : vector<8x256xf32>
    %cst_5 = arith.constant 0.000000e+00 : f32
    %7 = vector.broadcast %cst_5 : f32 to vector<8x256xf32>
    %8 = arith.maximumf %6, %7 : vector<8x256xf32>
    %9 = arith.truncf %8 : vector<8x256xf32> to vector<8x256xbf16>
    %c0_6 = arith.constant 0 : index
    %c0_7 = arith.constant 0 : index
    %10 = vector.load %arg4[%c0_6, %c0_7] : memref<256x256xbf16, #tpu.memory_space<vmem>>, vector<256x256xbf16>
    %cst_8 = arith.constant dense<0.000000e+00> : vector<8x256xf32>
    %11 = tpu.matmul %9, %10, %cst_8 {dimension_numbers = #tpu.dot_dimension_numbers<[1], [0], [0], [1], [0, 0, 1, 1], [], []>} : vector<8x256xbf16>, vector<256x256xbf16>, vector<8x256xf32> -> vector<8x256xf32>
    %c0_9 = arith.constant 0 : index
    %c0_10 = arith.constant 0 : index
    %12 = vector.load %arg5[%c0_9, %c0_10] : memref<1x256xf32, #tpu.memory_space<vmem>>, vector<1x256xf32>
    %13 = vector.broadcast %12 : vector<1x256xf32> to vector<8x256xf32>
    %14 = arith.addf %11, %13 : vector<8x256xf32>
    %cst_11 = arith.constant 0.000000e+00 : f32
    %15 = vector.broadcast %cst_11 : f32 to vector<8x256xf32>
    %16 = arith.maximumf %14, %15 : vector<8x256xf32>
    %17 = arith.truncf %16 : vector<8x256xf32> to vector<8x256xbf16>
    %c0_12 = arith.constant 0 : index
    %c0_13 = arith.constant 0 : index
    %18 = vector.load %arg6[%c0_12, %c0_13] : memref<256x128xbf16, #tpu.memory_space<vmem>>, vector<256x128xbf16>
    %cst_14 = arith.constant dense<0.000000e+00> : vector<8x128xf32>
    %19 = tpu.matmul %17, %18, %cst_14 {dimension_numbers = #tpu.dot_dimension_numbers<[1], [0], [0], [1], [0, 0, 1, 1], [], []>} : vector<8x256xbf16>, vector<256x128xbf16>, vector<8x128xf32> -> vector<8x128xf32>
    %c0_15 = arith.constant 0 : index
    %c0_16 = arith.constant 0 : index
    %20 = vector.load %arg7[%c0_15, %c0_16] : memref<1x128xf32, #tpu.memory_space<vmem>>, vector<1x128xf32>
    %21 = vector.broadcast %20 : vector<1x128xf32> to vector<8x128xf32>
    %22 = arith.addf %19, %21 : vector<8x128xf32>
    %23 = math.tanh %22 : vector<8x128xf32>
    %cst_17 = arith.constant 1.000000e+00 : f32
    %24 = vector.broadcast %cst_17 : f32 to vector<8x128xf32>
    %25 = arith.addf %23, %24 : vector<8x128xf32>
    %cst_18 = arith.constant 3.500000e+00 : f32
    %26 = vector.broadcast %cst_18 : f32 to vector<8x128xf32>
    %27 = arith.mulf %26, %25 : vector<8x128xf32>
    %cst_19 = arith.constant -5.000000e+00 : f32
    %28 = vector.broadcast %cst_19 : f32 to vector<8x128xf32>
    %29 = arith.addf %28, %27 : vector<8x128xf32>
    %30 = tpu.iota {dimensions = array<i32: 1>} : vector<8x128xi32>
    %c6_i32 = arith.constant 6 : i32
    %31 = vector.broadcast %c6_i32 : i32 to vector<8x128xi32>
    %32 = arith.cmpi sge, %30, %31 : vector<8x128xi32>
    %c12_i32 = arith.constant 12 : i32
    %33 = vector.broadcast %c12_i32 : i32 to vector<8x128xi32>
    %34 = arith.cmpi slt, %30, %33 : vector<8x128xi32>
    %35 = arith.andi %32, %34 : vector<8x128xi1>
    %36 = arith.select %35, %29, %22 : vector<8x128xi1>, vector<8x128xf32>
    %c0_20 = arith.constant 0 : index
    %c0_21 = arith.constant 0 : index
    %37 = vector.load %arg8[%c0_20, %c0_21] : memref<8x128xf32, #tpu.memory_space<vmem>>, vector<8x128xf32>
    tpu.vector_store %arg8[%c0_20, %c0_21], %36 {strides = array<i32>} : memref<8x128xf32, #tpu.memory_space<vmem>>, vector<8x128xf32>,
    return
  }
  func.func @transform_0(%arg0: i32) -> (i32, i32) {
    %c0_i32 = arith.constant 0 : i32
    %c0_i32_0 = arith.constant 0 : i32
    return %arg0, %c0_i32 : i32, i32
  }
  func.func @transform_1(%arg0: i32) -> (i32, i32) {
    %c0_i32 = arith.constant 0 : i32
    %c0_i32_0 = arith.constant 0 : i32
    %c0_i32_1 = arith.constant 0 : i32
    return %c0_i32, %c0_i32_0 : i32, i32
  }
  func.func @transform_2(%arg0: i32) -> (i32, i32) {
    %c0_i32 = arith.constant 0 : i32
    %c0_i32_0 = arith.constant 0 : i32
    %c0_i32_1 = arith.constant 0 : i32
    return %c0_i32, %c0_i32_0 : i32, i32
  }
  func.func @transform_3(%arg0: i32) -> (i32, i32) {
    %c0_i32 = arith.constant 0 : i32
    %c0_i32_0 = arith.constant 0 : i32
    %c0_i32_1 = arith.constant 0 : i32
    return %c0_i32, %c0_i32_0 : i32, i32
  }
  func.func @transform_4(%arg0: i32) -> (i32, i32) {
    %c0_i32 = arith.constant 0 : i32
    %c0_i32_0 = arith.constant 0 : i32
    %c0_i32_1 = arith.constant 0 : i32
    return %c0_i32, %c0_i32_0 : i32, i32
  }
  func.func @transform_5(%arg0: i32) -> (i32, i32) {
    %c0_i32 = arith.constant 0 : i32
    %c0_i32_0 = arith.constant 0 : i32
    %c0_i32_1 = arith.constant 0 : i32
    return %c0_i32, %c0_i32_0 : i32, i32
  }
  func.func @transform_6(%arg0: i32) -> (i32, i32) {
    %c0_i32 = arith.constant 0 : i32
    %c0_i32_0 = arith.constant 0 : i32
    %c0_i32_1 = arith.constant 0 : i32
    return %c0_i32, %c0_i32_0 : i32, i32
  }
  func.func @transform_7(%arg0: i32) -> (i32, i32) {
    %c0_i32 = arith.constant 0 : i32
    %c0_i32_0 = arith.constant 0 : i32
    return %arg0, %c0_i32 : i32, i32
  }
}

</mosaic_0001>

<bundles_post_ra>
// kernel: tpu_custom_call.1
= control target key start
LH: loop header
LB: loop body
LE: loop exit
PB: predicated region body
PF: predicated region fallthrough
CT: control target
= control target key end

     0   :  { %12 = vsyncpa [#allocation3], 0  ;;  %s1057_s0 = inlined_call_operand.hbm [shape: f32[8,128], index: 0, kind: input, shape index: {}]   ;;  %s1058_s1 = inlined_call_operand.hbm [shape: bf16[128,256], index: 1, kind: input, shape index: {}]   ;;  %s1059_s2 = inlined_call_operand.vmem [shape: f32[1,256], index: 2, kind: input, shape index: {}]   ;;  %s1060_s3 = inlined_call_operand.hbm [shape: bf16[256,256], index: 3, kind: input, shape index: {}]   ;;  %s1061_s4 = inlined_call_operand.vmem [shape: f32[1,256], index: 4, kind: input, shape index: {}]   ;;  %s1062_s5 = inlined_call_operand.hbm [shape: bf16[256,128], index: 5, kind: input, shape index: {}]   ;;  %s1063_s6 = inlined_call_operand.vmem [shape: f32[1,128], index: 6, kind: input, shape index: {}]   ;;  %s1064_s7 = inlined_call_operand.hbm [shape: f32[8,128], index: 7, kind: output, shape index: {}]  }
   0x1   :  { %13 = vsyncpa [#allocation6], 0 }
   0x2   :  { %14 = vsyncpa [#allocation9], 0 }
   0x3   :  { %15 = vsyncpa [#allocation4], 0  ;;  %s983_s24 = smov [#allocation5]  }
   0x4   :  { %s31_s25 = sshll.u32 %s983_s24, 4  ;;  %s32_s25 = int_to_ptr.vmem [resolvable:$true] %s31_s25 }
   0x5   :  { %s883_s26 = scalar_lea.vmem %s32_s25, 2048  ;;  %p888_p1 = scmp.lt.s32.totalorder %s32_s25, %s32_s25 }
   0x6   :  { %p884_p0 = scmp.ne.s32.totalorder %s32_s25, %s883_s26  ;;  %p889_p2 = scmp.lt.s32.totalorder %s883_s26, %s883_s26 }
   0x8   :  { %p890_p3 = por %p889_p2, %p888_p1 }
   0xa   :  { %p891_p4 = pnand %p890_p3, %p884_p0 }
   0xc   :  { %894 = shalt.err (!%p891_p4)
}
   0xd   :  { %s984_s27 = smov 128   ;;  %s985_s28 = smov 8  }
   0xe   :  { %37 = dma.hbm_to_vmem [thread:$0]  %s1058_s1, 2048, %s32_s25, [#allocation6], %s984_s27, %s984_s27, %s985_s28  }
   0xf   :  { %s986_s8 = smov [#allocation2]   ;;  %s987_s10 = smov [#allocation7]  }
  0x10   :  { %s22_s9 = sshll.u32 %s986_s8, 4  ;;  %s45_s11 = sshll.u32 %s987_s10, 4  ;;  %s23_s9 = int_to_ptr.vmem [resolvable:$true] %s22_s9  ;;  %s46_s11 = int_to_ptr.vmem [resolvable:$true] %s45_s11 }
  0x11   :  { %s903_s12 = scalar_lea.vmem %s23_s9, 128  ;;  %p908_p6 = scmp.lt.s32.totalorder %s23_s9, %s23_s9 }
  0x12   :  { %p904_p5 = scmp.ne.s32.totalorder %s23_s9, %s903_s12  ;;  %p909_p7 = scmp.lt.s32.totalorder %s903_s12, %s903_s12 }
  0x14   :  { %p910_p8 = por %p909_p7, %p908_p6 }
  0x16   :  { %p911_p9 = pnand %p910_p8, %p904_p5 }
  0x18   :  { %914 = shalt.err (!%p911_p9)
}
  0x19   :  { %25 = dma.hbm_to_vmem [thread:$0]  %s1057_s0, 128, %s23_s9, [#allocation3]  }
  0x1a   :  { %s923_s15 = scalar_lea.vmem %s46_s11, 4096  ;;  %p928_p11 = scmp.lt.s32.totalorder %s46_s11, %s46_s11 }
  0x1b   :  { %p924_p10 = scmp.ne.s32.totalorder %s46_s11, %s923_s15  ;;  %p929_p12 = scmp.lt.s32.totalorder %s923_s15, %s923_s15 }
  0x1d   :  { %p930_p13 = por %p929_p12, %p928_p11 }
  0x1f   :  { %p931_p0 = pnand %p930_p13, %p924_p10 }
  0x21   :  { %934 = shalt.err (!%p931_p0)
}
  0x22   :  { %51 = dma.hbm_to_vmem [thread:$0]  %s1060_s3, 4096, %s46_s11, [#allocation6], %s984_s27, %s984_s27, %s985_s28  }
  0x23   :  { %s988_s17 = smov [#allocation8]  }
  0x24   :  { %s59_s18 = sshll.u32 %s988_s17, 4  ;;  %s60_s18 = int_to_ptr.vmem [resolvable:$true] %s59_s18 }
  0x25   :  { %s943_s19 = scalar_lea.vmem %s60_s18, 2048  ;;  %p948_p2 = scmp.lt.s32.totalorder %s60_s18, %s60_s18 }
  0x26   :  { %p944_p1 = scmp.ne.s32.totalorder %s60_s18, %s943_s19  ;;  %p949_p3 = scmp.lt.s32.totalorder %s943_s19, %s943_s19 }
  0x28   :  { %p950_p4 = por %p949_p3, %p948_p2 }
  0x2a   :  { %p951_p5 = pnand %p950_p4, %p944_p1 }
  0x2c   :  { %954 = shalt.err (!%p951_p5)
}
  0x2d   :  { %s989_s0 = smov 64   ;;  %s990_s20 = smov 4  }
  0x2e   :  { %65 = dma.hbm_to_vmem [thread:$0]  %s1062_s5, 2048, %s60_s18, [#allocation9], %s989_s0, %s989_s0, %s990_s20  }
  0x2f   :  { %975 = dma.done.wait [#allocation3], 128  }
  0x30   :  { %976 = vsyncadd [#allocation3], 4294967168 }
  0x31   :  { %977 = dma.done.wait [#allocation6], 6144  }
  0x32   :  { %978 = vsyncadd [#allocation6], 4294961152 }
  0x33   :  { %979 = dma.done.wait [#allocation9], 2048  }
  0x34   :  { %980 = vsyncadd [#allocation9], 4294965248  ;;  %v991_v0 = vmov 0   ;;  %v785_v1 = vld [vmem:[#allocation5 + $0x74] ss:$8 sps:$4 sm:$0xff]   ;;  %v861_v55 = vld [vmem:[#allocation8 + $0x68] sm:$0xff]   ;;  %v101_v63 = vlaneseq }
  0x35   :  { %223 = vmatprep.mubr.bf16.mxu0 %v991_v0  ;;  %v787_v2 = vld [vmem:[#allocation5 + $0x70] ss:$8 sps:$4 sm:$0xff]   ;;  %191 = vmatprep.subr.bf16.mxu0 %v785_v1  ;;  %v788_v3 = vld [vmem:[#allocation5 + $0x64] ss:$8 sps:$4 sm:$0xff]   ;;  %v790_v4 = vld [vmem:[#allocation5 + $0x60] ss:$8 sps:$4 sm:$0xff]  }
  0x36   :  { %192 = vmatpush1.bf16.msra.mxu0 %v787_v2  ;;  %v791_v5 = vld [vmem:[#allocation5 + $0x54] ss:$8 sps:$4 sm:$0xff]   ;;  %v793_v6 = vld [vmem:[#allocation5 + $0x50] ss:$8 sps:$4 sm:$0xff]   ;;  %v794_v7 = vld [vmem:[#allocation5 + $0x44] ss:$8 sps:$4 sm:$0xff]  }
  0x37   :  { %193 = vmatprep.subr.bf16.mxu0 %v788_v3  ;;  %v796_v8 = vld [vmem:[#allocation5 + $0x40] ss:$8 sps:$4 sm:$0xff]   ;;  %v797_v9 = vld [vmem:[#allocation5 + $0x34] ss:$8 sps:$4 sm:$0xff]   ;;  %v811_v11 = vld [vmem:[#allocation7 + $0x70] ss:$8 sps:$4 sm:$0xff]  }
  0x38   :  { %v809_v10 = vld [vmem:[#allocation7 + $0x74] ss:$8 sps:$4 sm:$0xff]   ;;  %v812_v12 = vld [vmem:[#allocation7 + $0x64] ss:$8 sps:$4 sm:$0xff]   ;;  %v799_v13 = vld [vmem:[#allocation5 + $0x30] ss:$8 sps:$4 sm:$0xff]  }
  0x39   :  { %440 = vmatprep.subr.bf16.mxu1 %v809_v10  ;;  %v814_v14 = vld [vmem:[#allocation7 + $0x60] ss:$8 sps:$4 sm:$0xff]   ;;  %v815_v15 = vld [vmem:[#allocation7 + $0x54] ss:$8 sps:$4 sm:$0xff]   ;;  %v800_v16 = vld [vmem:[#allocation5 + $0x24] ss:$8 sps:$4 sm:$0xff]  }
  0x3a   :  { %194 = vmatpush1.bf16.msra.mxu0 %v790_v4  ;;  %441 = vmatpush1.bf16.msra.mxu1 %v811_v11  ;;  %v802_v17 = vld [vmem:[#allocation5 + $0x20] ss:$8 sps:$4 sm:$0xff]   ;;  %v817_v18 = vld [vmem:[#allocation7 + $0x50] ss:$8 sps:$4 sm:$0xff]   ;;  %v818_v19 = vld [vmem:[#allocation7 + $0x44] ss:$8 sps:$4 sm:$0xff]  }
  0x3b   :  { %195 = vmatprep.subr.bf16.mxu0 %v791_v5  ;;  %442 = vmatprep.subr.bf16.mxu1 %v812_v12  ;;  %v803_v20 = vld [vmem:[#allocation5 + $0x14] ss:$8 sps:$4 sm:$0xff]   ;;  %v805_v21 = vld [vmem:[#allocation5 + $0x10] ss:$8 sps:$4 sm:$0xff]   ;;  %v820_v22 = vld [vmem:[#allocation7 + $0x40] ss:$8 sps:$4 sm:$0xff]  }
  0x3c   :  { %v821_v23 = vld [vmem:[#allocation7 + $0x34] ss:$8 sps:$4 sm:$0xff]   ;;  %v806_v24 = vld [vmem:[#allocation5 + $0x4] ss:$8 sps:$4 sm:$0xff]   ;;  %v808_v25 = vld [vmem:[#allocation5] ss:$8 sps:$4 sm:$0xff]  }
  0x3d   :  { %v81_v26 = vld [vmem:[#allocation2] sm:$0xff]  ;;  %v824_v28 = vld [vmem:[#allocation7 + $0x24] ss:$8 sps:$4 sm:$0xff]   ;;  %v826_v29 = vld [vmem:[#allocation7 + $0x20] ss:$8 sps:$4 sm:$0xff]   ;;  %v102_v0 = vshrl.u32 %v101_v63, 7 }
  0x3e   :  { %196 = vmatpush1.bf16.msra.mxu0 %v793_v6  ;;  %443 = vmatpush1.bf16.msra.mxu1 %v814_v14  ;;  %v823_v27 = vld [vmem:[#allocation7 + $0x30] ss:$8 sps:$4 sm:$0xff]   ;;  %v827_v30 = vld [vmem:[#allocation7 + $0x14] ss:$8 sps:$4 sm:$0xff]   ;;  %v82_v31 = vpack.c.bf16 %v81_v26, %v81_v26  ;;  %v830_v33 = vld [vmem:[#allocation7 + $0x4] ss:$8 sps:$4 sm:$0xff]  }
  0x3f   :  { %197 = vmatprep.subr.bf16.mxu0 %v794_v7  ;;  %444 = vmatprep.subr.bf16.mxu1 %v815_v15  ;;  %v829_v32 = vld [vmem:[#allocation7 + $0x10] ss:$8 sps:$4 sm:$0xff]   ;;  %v832_v34 = vld [vmem:[#allocation7] ss:$8 sps:$4 sm:$0xff]   ;;  %v833_v35 = vld [vmem:[#allocation7 + $0xf4] ss:$8 sps:$4 sm:$0xff]  }
  0x40   :  { %v835_v36 = vld [vmem:[#allocation7 + $0xf0] ss:$8 sps:$4 sm:$0xff]   ;;  %v836_v37 = vld [vmem:[#allocation7 + $0xe4] ss:$8 sps:$4 sm:$0xff]   ;;  %v838_v38 = vld [vmem:[#allocation7 + $0xe0] ss:$8 sps:$4 sm:$0xff]  }
  0x41   :  { %v839_v39 = vld [vmem:[#allocation7 + $0xd4] ss:$8 sps:$4 sm:$0xff]   ;;  %v841_v40 = vld [vmem:[#allocation7 + $0xd0] ss:$8 sps:$4 sm:$0xff]   ;;  %v842_v41 = vld [vmem:[#allocation7 + $0xc4] ss:$8 sps:$4 sm:$0xff]  }
  0x42   :  { %198 = vmatpush1.bf16.msra.mxu0 %v796_v8  ;;  %445 = vmatpush1.bf16.msra.mxu1 %v817_v18  ;;  %v844_v42 = vld [vmem:[#allocation7 + $0xc0] ss:$8 sps:$4 sm:$0xff]   ;;  %v845_v43 = vld [vmem:[#allocation7 + $0xb4] ss:$8 sps:$4 sm:$0xff]   ;;  %v847_v44 = vld [vmem:[#allocation7 + $0xb0] ss:$8 sps:$4 sm:$0xff]  }
  0x43   :  { %199 = vmatprep.subr.bf16.mxu0 %v797_v9  ;;  %446 = vmatprep.subr.bf16.mxu1 %v818_v19  ;;  %v848_v45 = vld [vmem:[#allocation7 + $0xa4] ss:$8 sps:$4 sm:$0xff]   ;;  %v850_v46 = vld [vmem:[#allocation7 + $0xa0] ss:$8 sps:$4 sm:$0xff]   ;;  %v851_v47 = vld [vmem:[#allocation7 + $0x94] ss:$8 sps:$4 sm:$0xff]  }
  0x44   :  { %v853_v48 = vld [vmem:[#allocation7 + $0x90] ss:$8 sps:$4 sm:$0xff]   ;;  %v854_v49 = vld [vmem:[#allocation7 + $0x84] ss:$8 sps:$4 sm:$0xff]   ;;  %v856_v50 = vld [vmem:[#allocation7 + $0x80] ss:$8 sps:$4 sm:$0xff]  }
  0x45   :  { %v857_v51 = vld [vmem:[#allocation8 + $0x78] sm:$0xff]   ;;  %v859_v53 = vld [vmem:[#allocation8 + $0x70] sm:$0xff]   ;;  %v862_v56 = vld [vmem:[#allocation8 + $0x28] sm:$0xff]   ;;  %v103_v1 = vsub.s32 0, %v102_v0  ;;  %v107_v3 = vsub.s32 1, %v102_v0 }
  0x46   :  { %200 = vmatpush1.bf16.msra.mxu0 %v799_v13  ;;  %447 = vmatpush1.bf16.msra.mxu1 %v820_v22  ;;  %v858_v52 = vld [vmem:[#allocation8 + $0x38] sm:$0xff]   ;;  %v860_v54 = vld [vmem:[#allocation8 + $0x30] sm:$0xff]   ;;  %v863_v57 = vld [vmem:[#allocation8 + $0x60] sm:$0xff]  }
  0x47   :  { %201 = vmatprep.subr.bf16.mxu0 %v800_v16  ;;  %448 = vmatprep.subr.bf16.mxu1 %v821_v23  ;;  %v864_v58 = vld [vmem:[#allocation8 + $0x20] sm:$0xff]   ;;  %v865_v59 = vld [vmem:[#allocation8 + $0x58] sm:$0xff]   ;;  %v867_v61 = vld [vmem:[#allocation8 + $0x50] sm:$0xff]  }
  0x48   :  { %v866_v60 = vld [vmem:[#allocation8 + $0x18] sm:$0xff]   ;;  %v868_v62 = vld [vmem:[#allocation8 + $0x10] sm:$0xff]   ;;  %v869_v16 = vld [vmem:[#allocation8 + $0x48] sm:$0xff]  }
  0x49   :  { %v99_v2 = vld [vmem:[%s1059_s2] sm:$0x3]  ;;  %v871_v18 = vld [vmem:[#allocation8 + $0x40] sm:$0xff]  }
  0x4a   :  { %202 = vmatpush1.bf16.msra.mxu0 %v802_v17  ;;  %449 = vmatpush1.bf16.msra.mxu1 %v823_v27  ;;  %v104_v4 = vrot.slane %v99_v2, %v103_v1  ;;  %v108_v5 = vrot.slane %v99_v2, %v107_v3  ;;  %v870_v17 = vld [vmem:[#allocation8 + $0x8] sm:$0xff]   ;;  %v872_v19 = vld [vmem:[#allocation8] sm:$0xff]  }
  0x4b   :  { %203 = vmatprep.subr.bf16.mxu0 %v803_v20  ;;  %450 = vmatprep.subr.bf16.mxu1 %v824_v28  ;;  %v268_v20 = vld [vmem:[%s1061_s4] sm:$0x3]  ;;  %s992_s4 = smov [#allocation10]  }
  0x4c   :  { %v277_v22 = vrot.slane %v268_v20, %v107_v3  ;;  %s677_s26 = sshll.u32 %s992_s4, 4  ;;  %s678_s26 = int_to_ptr.vmem [resolvable:$true] %s677_s26 }
  0x4d   :  { %p960_p7 = scmp.lt.s32.totalorder %s678_s26, %s678_s26 }
  0x4e   :  { %204 = vmatpush1.bf16.msra.mxu0 %v805_v21  ;;  %451 = vmatpush1.bf16.msra.mxu1 %v826_v29  ;;  %v273_v21 = vrot.slane %v268_v20, %v103_v1 }
  0x4f   :  { %205 = vmatprep.subr.bf16.mxu0 %v806_v24  ;;  %452 = vmatprep.subr.bf16.mxu1 %v827_v30 }
  0x52   :  { %206 = vmatpush1.bf16.msra.mxu0 %v808_v25  ;;  %453 = vmatpush1.bf16.msra.mxu1 %v829_v32 }
  0x53   :  { %454 = vmatprep.subr.bf16.mxu1 %v830_v33  ;;  %753 = vmatprep.subr.bf16.mxu0 %v857_v51 }
  0x55   :  { %224 = vmatmul.mubr.bf16.vlgmr.msra.gmra.mxu0 %v82_v31 }
  0x56   :  { %455 = vmatpush1.bf16.msra.mxu1 %v832_v34  ;;  %754 = vmatpush3.bf16.msra.mxu0 %v858_v52  ;;  %v736_v34 = vld [vmem:[%s1063_s6] ss:$0 sm:$0xff]  ;;  %s955_s6 = scalar_lea.vmem %s678_s26, 128 }
  0x57   :  { %456 = vmatprep.subr.bf16.mxu1 %v833_v35  ;;  %755 = vmatprep.subr.bf16.mxu0 %v859_v53  ;;  %p956_p6 = scmp.ne.s32.totalorder %s678_s26, %s955_s6  ;;  %p961_p8 = scmp.lt.s32.totalorder %s955_s6, %s955_s6 }
  0x59   :  { %p962_p9 = por %p961_p8, %p960_p7 }
  0x5a   :  { %457 = vmatpush2.bf16.msra.mxu1 %v835_v36  ;;  %756 = vmatpush3.bf16.msra.mxu0 %v860_v54 }
  0x5b   :  { %458 = vmatprep.subr.bf16.mxu1 %v836_v37  ;;  %757 = vmatprep.subr.bf16.mxu0 %v861_v55  ;;  %p963_p10 = pnand %p962_p9, %p956_p6 }
  0x5e   :  { %459 = vmatpush2.bf16.msra.mxu1 %v838_v38  ;;  %758 = vmatpush3.bf16.msra.mxu0 %v862_v56 }
  0x5f   :  { %460 = vmatprep.subr.bf16.mxu1 %v839_v39  ;;  %759 = vmatprep.subr.bf16.mxu0 %v863_v57 }
  0x62   :  { %461 = vmatpush2.bf16.msra.mxu1 %v841_v40  ;;  %760 = vmatpush3.bf16.msra.mxu0 %v864_v58  ;;  %v665_v40 = vand.u32 127, %v101_v63 }
  0x63   :  { %462 = vmatprep.subr.bf16.mxu1 %v842_v41  ;;  %761 = vmatprep.subr.bf16.mxu0 %v865_v59 }
  0x64   :  { %vm666_vm0 = vcmp.ge.s32.totalorder %v665_v40, 6  ;;  %vm667_vm1 = vcmp.lt.s32.totalorder %v665_v40, 12 }
  0x65   :  { %vm668_vm2 = vmand %vm666_vm0, %vm667_vm1 }
  0x66   :  { %463 = vmatpush2.bf16.msra.mxu1 %v844_v42  ;;  %762 = vmatpush3.bf16.msra.mxu0 %v866_v60 }
  0x67   :  { %464 = vmatprep.subr.bf16.mxu1 %v845_v43  ;;  %763 = vmatprep.subr.bf16.mxu0 %v867_v61 }
  0x6a   :  { %465 = vmatpush2.bf16.msra.mxu1 %v847_v44  ;;  %764 = vmatpush3.bf16.msra.mxu0 %v868_v62 }
  0x6b   :  { %466 = vmatprep.subr.bf16.mxu1 %v848_v45  ;;  %765 = vmatprep.subr.bf16.mxu0 %v869_v16 }
  0x6e   :  { %467 = vmatpush2.bf16.msra.mxu1 %v850_v46  ;;  %766 = vmatpush3.bf16.msra.mxu0 %v870_v17 }
  0x6f   :  { %468 = vmatprep.subr.bf16.mxu1 %v851_v47  ;;  %767 = vmatprep.subr.bf16.mxu0 %v871_v18 }
  0x72   :  { %469 = vmatpush2.bf16.msra.mxu1 %v853_v48  ;;  %768 = vmatpush3.bf16.msra.mxu0 %v872_v19 }
  0x73   :  { %470 = vmatprep.subr.bf16.mxu1 %v854_v49 }
  0x76   :  { %471 = vmatpush2.bf16.msra.mxu1 %v856_v50 }
 0x115   :  { %v225_v6 = vpop.f32.mrf.mxu0 }
 0x116   :  { %v226_v7 = vadd.f32 %v225_v6, %v104_v4 }
 0x117   :  { %v227_v8 = vpop.f32.mrf.mxu0 }
 0x118   :  { %v228_v9 = vadd.f32 %v227_v8, %v108_v5  ;;  %v232_v10 = vmax.f32 %v226_v7, 0.0 }
 0x119   :  { %v229_v11 = vpop.f32.mrf.mxu0 }
 0x11a   :  { %v233_v12 = vmax.f32 %v228_v9, 0.0  ;;  %v234_v15 = vpack.c.bf16 %v232_v10, %v232_v10 }
 0x11b   :  { %v230_v13 = vpop.f32.mrf.mxu0 }
 0x11c   :  { %v235_v14 = vpack.c.bf16 %v233_v12, %v233_v12 }
 0x11e   :  { %472 = vmatprep.mubr.bf16.mxu1 %v235_v14 }
 0x11f   :  { %473 = vmatmul.mubr.bf16.vlgmr.msra.gmra.mxu1 %v234_v15 }
 0x1df   :  { %v474_v23 = vpop.f32.mrf.mxu1 }
 0x1e0   :  { %v475_v24 = vadd.f32 %v474_v23, %v273_v21 }
 0x1e1   :  { %v476_v25 = vpop.f32.mrf.mxu1 }
 0x1e2   :  { %v477_v26 = vadd.f32 %v476_v25, %v277_v22  ;;  %v481_v27 = vmax.f32 %v475_v24, 0.0 }
 0x1e3   :  { %v478_v28 = vpop.f32.mrf.mxu1 }
 0x1e4   :  { %v482_v29 = vmax.f32 %v477_v26, 0.0  ;;  %v483_v32 = vpack.c.bf16 %v481_v27, %v481_v27 }
 0x1e5   :  { %v479_v30 = vpop.f32.mrf.mxu1 }
 0x1e6   :  { %v484_v31 = vpack.c.bf16 %v482_v29, %v482_v29 }
 0x1e8   :  { %652 = vmatprep.mubr.bf16.mxu0 %v484_v31 }
 0x1e9   :  { %653 = vmatmul.mubr.bf16.vlgmr.msra.gmra.mxu0 %v483_v32 }
 0x2a9   :  { %v769_v33 = vpop.f32.mrf.mxu0 }
 0x2ab   :  { %v770_v35 = vpop.f32.mrf.mxu0 }
 0x2ac   :  { %v771_v36 = vadd.f32 %v770_v35, %v769_v33 }
 0x2ad   :  { %v772_v37 = vpop.f32.mrf.mxu0 }
 0x2ae   :  { %v655_v38 = vadd.f32 %v771_v36, %v736_v34 }
 0x2af   :  { %v773_v39 = vpop.f32.mrf.mxu0 }
 0x2b0   :  { %873 = vtanh.f32 %v655_v38 }
 0x2bd   :  { %v874_v41 = vpop.eup %873 }
 0x2be   :  { %v661_v42 = vadd.f32 1.0, %v874_v41 }
 0x2c0   :  { %v662_v43 = vmul.f32 3.5, %v661_v42 }
 0x2c2   :  { %v663_v44 = vadd.f32 -5.0, %v662_v43 }
 0x2c4   :  { %v669_v45 = vsel %vm668_vm2, %v663_v44, %v655_v38 }
 0x2c5   :  { %670 = vst [vmem:[#allocation10] sm:$0xff] %v669_v45 }
 0x2c6   :  { %966 = shalt.err (!%p963_p10)
}
 0x2c7   :  { %680 = dma.vmem_to_hbm [thread:$0]  %s678_s26, 128, %s1064_s7, [#allocation4]  }
 0x2c8   :  { %981 = dma.done.wait [#allocation4], 128  }
 0x2c9   :  { %982 = vsyncadd [#allocation4], 4294967168 }
 0x2ca   :  { %684 = vsyncpa [#allocation3], 1 }
 0x2cb   :  { %685 = vsyncpa [#allocation6], 1 }
 0x2cc   :  { %686 = vsyncpa [#allocation9], 1 }
 0x2cd   :  { %687 = vsyncpa [#allocation4], 1 }

</bundles_post_ra>
